<compile_context>
chip_gen: v6e
topology: v6e:2x2x1
jax: 0.10.0
libtpu: 0.0.40
codegen_flags: <defaults>
</compile_context>

<pallas_src>
import jax
import jax.numpy as jnp
from jax.experimental import pallas as pl
from jax.experimental.pallas import tpu as pltpu


# ---------------------------------------------------------------------------
# Kernels
# ---------------------------------------------------------------------------

def _sensor_interleaved_kernel(x_ref, o_ref):
    """x_ref: (tr, 2*tc) f32 with lanes interleaved [re0, im0, re1, im1, ...]."""
    x = x_ref[...]
    sq = x * x
    tr, two_tc = sq.shape
    # Pair-sum adjacent lanes: |z|^2 = re^2 + im^2 (order of the pair does not
    # matter for the sum, so the re/im byte order is irrelevant here).
    inten = sq.reshape(tr, two_tc // 2, 2).sum(axis=-1)
    # tanh lowers to the EUP; on v5e/v6e HBM binds first so it is free.
    o_ref[...] = jnp.tanh(inten)


def _sensor_planar_kernel(re_ref, im_ref, o_ref):
    """Fallback: separate real/imag planes (same math, two input streams)."""
    re = re_ref[...]
    im = im_ref[...]
    o_ref[...] = jnp.tanh(re * re + im * im)


# ---------------------------------------------------------------------------
# Layout / tiling
# ---------------------------------------------------------------------------

_LANE_WIDTHS = (2048, 1024, 512, 256, 128)   # candidate output lane widths
_TARGET_BLOCK_ELEMS = 512 * 1024             # 2 MiB f32 per output block


def _choose_layout(n):
    """Pick (rows, cols, tr) for a flattened slab of n output f32 elements.

    Returns None if n is not a multiple of 128 (caller pads).
    """
    cols = None
    # Prefer wide lanes, but keep at least 8 sublane rows when possible.
    for c in _LANE_WIDTHS:
        if n % c == 0 and (n // c) >= 8:
            cols = c
            break
    if cols is None:
        for c in _LANE_WIDTHS:
            if n % c == 0:
                cols = c
                break
    if cols is None:
        return None
    rows = n // cols

    tr_target = max(8, _TARGET_BLOCK_ELEMS // cols)
    if rows <= tr_target:
        if rows >= 16 and rows % 16 == 0:
            # Split into exactly 2 full blocks so both v7x TensorCores stream.
            tr = rows // 2
        else:
            tr = rows            # single block; block dims == full dims (legal)
    else:
        tr = tr_target           # multiple of 8; edge rows handled by Pallas
    return rows, cols, tr


def _cost(n):
    # 2 squares + 1 add per element; one tanh; 8 B read + 4 B write per element.
    return pl.CostEstimate(flops=3 * n, transcendentals=n, bytes_accessed=12 * n)


# ---------------------------------------------------------------------------
# Wrappers
# ---------------------------------------------------------------------------

@jax.jit
def _forward_interleaved(field):
    """Fast path: single interleaved f32 stream, deinterleave in-kernel."""
    B, C, H, W = field.shape
    n = B * C * H * W

    # Zero-copy reinterpretation of the complex64 buffer as (..., 2) float32.
    pairs = jax.lax.bitcast_convert_type(field, jnp.float32)
    flat = pairs.reshape(-1)                      # (2n,) interleaved re/im

    layout = _choose_layout(n)
    n_pad = n
    if layout is None:                            # ragged fallback: pad to 128
        n_pad = ((n + 127) // 128) * 128
        flat = jnp.pad(flat, (0, 2 * (n_pad - n)))
        layout = _choose_layout(n_pad)
    rows, cols, tr = layout
    x2d = flat.reshape(rows, 2 * cols)

    grid = (pl.cdiv(rows, tr),)
    out = pl.pallas_call(
        _sensor_interleaved_kernel,
        out_shape=jax.ShapeDtypeStruct((rows, cols), jnp.float32),
        grid=grid,
        in_specs=[pl.BlockSpec((tr, 2 * cols), lambda i: (i, 0))],
        out_specs=pl.BlockSpec((tr, cols), lambda i: (i, 0)),
        compiler_params=pltpu.CompilerParams(
            dimension_semantics=("parallel",),
            allow_input_fusion=[True],
        ),
        cost_estimate=_cost(n_pad),
    )(x2d)

    out_flat = out.reshape(-1)
    if n_pad != n:
        out_flat = out_flat[:n]
    return out_flat.reshape(B, C, H, W)


@jax.jit
def _forward_planar(field):
    """Safe fallback path: two contiguous real/imag planes (extra HBM traffic)."""
    B, C, H, W = field.shape
    n = B * C * H * W
    re = jnp.real(field).astype(jnp.float32).reshape(-1)
    im = jnp.imag(field).astype(jnp.float32).reshape(-1)

    layout = _choose_layout(n)
    n_pad = n
    if layout is None:
        n_pad = ((n + 127) // 128) * 128
        re = jnp.pad(re, (0, n_pad - n))
        im = jnp.pad(im, (0, n_pad - n))
        layout = _choose_layout(n_pad)
    rows, cols, tr = layout
    re2 = re.reshape(rows, cols)
    im2 = im.reshape(rows, cols)

    grid = (pl.cdiv(rows, tr),)
    out = pl.pallas_call(
        _sensor_planar_kernel,
        out_shape=jax.ShapeDtypeStruct((rows, cols), jnp.float32),
        grid=grid,
        in_specs=[pl.BlockSpec((tr, cols), lambda i: (i, 0)),
                  pl.BlockSpec((tr, cols), lambda i: (i, 0))],
        out_specs=pl.BlockSpec((tr, cols), lambda i: (i, 0)),
        compiler_params=pltpu.CompilerParams(
            dimension_semantics=("parallel",),
            allow_input_fusion=[True, True],
        ),
        cost_estimate=_cost(n_pad),
    )(re2, im2)

    out_flat = out.reshape(-1)
    if n_pad != n:
        out_flat = out_flat[:n]
    return out_flat.reshape(B, C, H, W)


def sensor_forward(input_field: jax.Array) -> jax.Array:
    """Pallas implementation of Sensor.forward.

    input_field: complex64 array of shape (B, C, H, W) (NCHW, like PyTorch).
    returns: float32 array of shape (B, C, H, W).
    """
    assert jnp.issubdtype(input_field.dtype, jnp.complexfloating)
    # Try the single-stream fused path; if this Mosaic build cannot lower the
    # in-kernel lane deinterleave (or the complex bitcast), fall back to the
    # planar two-stream kernel which is known-good.
    try:
        out = _forward_interleaved(input_field)
        jax.block_until_ready(out)   # surface any deferred lowering/runtime error
        return out
    except Exception:
        return _forward_planar(input_field)


def sensor_reference(input_field: jax.Array) -> jax.Array:
    x = jnp.real(input_field) ** 2 + jnp.imag(input_field) ** 2
    return jnp.tanh(x).astype(jnp.float32)


if __name__ == "__main__":
    key = jax.random.PRNGKey(0)
    k1, k2, k3, k4 = jax.random.split(key, 4)

    # Small NCHW complex field, consistent with the module.
    B, C, H, W = 2, 4, 16, 16
    re = jax.random.normal(k1, (B, C, H, W), dtype=jnp.float32)
    im = jax.random.normal(k2, (B, C, H, W), dtype=jnp.float32)
    field = (re + 1j * im).astype(jnp.complex64)

    out = jax.block_until_ready(sensor_forward(field))
    ref = sensor_reference(field)
    assert out.shape == (B, C, H, W)
    assert out.dtype == jnp.float32
    assert jnp.allclose(out, ref, atol=1e-5, rtol=1e-5)

    # Larger field exercising the multi-step pipelined (and dual-TC) grid path.
    B2, C2, H2, W2 = 2, 4, 128, 128
    re2 = jax.random.normal(k3, (B2, C2, H2, W2), dtype=jnp.float32)
    im2 = jax.random.normal(k4, (B2, C2, H2, W2), dtype=jnp.float32)
    field2 = (re2 + 1j * im2).astype(jnp.complex64)

    out2 = jax.block_until_ready(sensor_forward(field2))
    ref2 = sensor_reference(field2)
    assert out2.shape == (B2, C2, H2, W2)
    assert jnp.allclose(out2, ref2, atol=1e-5, rtol=1e-5)

    print("KERNEL_OK")
</pallas_src>

<mosaic_0001>
module attributes {stable_mosaic.version = 11 : i64} {
  func.func @_sensor_planar_kernel(%arg0: i32, %arg1: memref<8x256xf32, #tpu.memory_space<vmem>>, %arg2: memref<8x256xf32, #tpu.memory_space<vmem>>, %arg3: memref<8x256xf32, #tpu.memory_space<vmem>>) attributes {dimension_semantics = [#tpu.dimension_semantics<parallel>], iteration_bounds = array<i64: 1>, scalar_prefetch = 0 : i64, scratch_operands = 0 : i64, tpu.core_type = #tpu.core_type<tc>, window_params = [{transform_indices = @transform_0, window_bounds = array<i64: 8, 256>}, {transform_indices = @transform_1, window_bounds = array<i64: 8, 256>}, {transform_indices = @transform_2, window_bounds = array<i64: 8, 256>}]} {
    %c0 = arith.constant 0 : index
    %c0_0 = arith.constant 0 : index
    %0 = vector.load %arg1[%c0, %c0_0] : memref<8x256xf32, #tpu.memory_space<vmem>>, vector<8x256xf32>
    %c0_1 = arith.constant 0 : index
    %c0_2 = arith.constant 0 : index
    %1 = vector.load %arg2[%c0_1, %c0_2] : memref<8x256xf32, #tpu.memory_space<vmem>>, vector<8x256xf32>
    %2 = arith.mulf %0, %0 : vector<8x256xf32>
    %3 = arith.mulf %1, %1 : vector<8x256xf32>
    %4 = arith.addf %2, %3 : vector<8x256xf32>
    %5 = math.tanh %4 : vector<8x256xf32>
    %c0_3 = arith.constant 0 : index
    %c0_4 = arith.constant 0 : index
    %6 = vector.load %arg3[%c0_3, %c0_4] : memref<8x256xf32, #tpu.memory_space<vmem>>, vector<8x256xf32>
    tpu.vector_store %arg3[%c0_3, %c0_4], %5 {strides = array<i32>} : memref<8x256xf32, #tpu.memory_space<vmem>>, vector<8x256xf32>,
    return
  }
  func.func @transform_0(%arg0: i32) -> (i32, i32) {
    %c0_i32 = arith.constant 0 : i32
    %c0_i32_0 = arith.constant 0 : i32
    return %arg0, %c0_i32 : i32, i32
  }
  func.func @transform_1(%arg0: i32) -> (i32, i32) {
    %c0_i32 = arith.constant 0 : i32
    %c0_i32_0 = arith.constant 0 : i32
    return %arg0, %c0_i32 : i32, i32
  }
  func.func @transform_2(%arg0: i32) -> (i32, i32) {
    %c0_i32 = arith.constant 0 : i32
    %c0_i32_0 = arith.constant 0 : i32
    return %arg0, %c0_i32 : i32, i32
  }
}

</mosaic_0001>

<bundles_post_ra>
// kernel: custom-call.1
= control target key start
LH: loop header
LB: loop body
LE: loop exit
PB: predicated region body
PF: predicated region fallthrough
CT: control target
= control target key end

     0   :  { %s51_s0 = inlined_call_operand.hbm [shape: c64[2,4,16,16], index: 0, kind: input, shape index: {}]   ;;  %s52_s1 = inlined_call_operand.vmem [shape: f32[2,4,16,16], index: 1, kind: output, shape index: {}]  }
   0x1   :  { %s2_s8 = scalar_lea.hbm %s51_s0, 2048 }
   0x2   :  { %3 = vsyncpa [#allocation0], 0  ;;  %s4_s11 = sshll.u32 %s52_s1, 4  ;;  %s5_s11 = int_to_ptr.vmem [resolvable:$true] %s4_s11 }
   0x3   :  { %s20_s12 = scalar_lea.vmem %s5_s11, 2048  ;;  %p25_p1 = scmp.lt.s32.totalorder %s5_s11, %s5_s11 }
   0x4   :  { %p21_p0 = scmp.ne.s32.totalorder %s5_s11, %s20_s12  ;;  %p26_p2 = scmp.lt.s32.totalorder %s20_s12, %s20_s12 }
   0x6   :  { %p27_p3 = por %p26_p2, %p25_p1 }
   0x8   :  { %p28_p4 = pnand %p27_p3, %p21_p0 }
   0xa   :  { %31 = shalt.err (!%p28_p4)  }
   0xb   :  { %7 = dma.hbm_to_vmem [thread:$0]  %s2_s8, 2048, %s5_s11, [#allocation0] }
   0xc   :  { %33 = dma.done.wait [#allocation0], 2048  }
   0xd   :  { %34 = vsyncadd [#allocation0], 4294965248 }
   0xe   :  { %9 = vsyncpa [#allocation0], 1 }

// kernel: custom-call
= control target key start
LH: loop header
LB: loop body
LE: loop exit
PB: predicated region body
PF: predicated region fallthrough
CT: control target
= control target key end

     0   :  { %2 = vsyncpa [#allocation0], 0  ;;  %s47_s0 = inlined_call_operand.hbm [shape: c64[2,4,16,16], index: 0, kind: input, shape index: {}]   ;;  %s48_s1 = inlined_call_operand.vmem [shape: f32[2,4,16,16], index: 1, kind: output, shape index: {}]  }
   0x1   :  { %s3_s8 = sshll.u32 %s48_s1, 4  ;;  %s4_s8 = int_to_ptr.vmem [resolvable:$true] %s3_s8 }
   0x2   :  { %s17_s9 = scalar_lea.vmem %s4_s8, 2048  ;;  %p22_p1 = scmp.lt.s32.totalorder %s4_s8, %s4_s8 }
   0x3   :  { %p18_p0 = scmp.ne.s32.totalorder %s4_s8, %s17_s9  ;;  %p23_p2 = scmp.lt.s32.totalorder %s17_s9, %s17_s9 }
   0x5   :  { %p24_p3 = por %p23_p2, %p22_p1 }
   0x7   :  { %p25_p4 = pnand %p24_p3, %p18_p0 }
   0x9   :  { %28 = shalt.err (!%p25_p4)  }
   0xa   :  { %6 = dma.hbm_to_vmem [thread:$0]  %s47_s0, 2048, %s4_s8, [#allocation0] }
   0xb   :  { %29 = dma.done.wait [#allocation0], 2048  }
   0xc   :  { %30 = vsyncadd [#allocation0], 4294965248 }
   0xd   :  { %8 = vsyncpa [#allocation0], 1 }

// kernel: _forward_planar.1
= control target key start
LH: loop header
LB: loop body
LE: loop exit
PB: predicated region body
PF: predicated region fallthrough
CT: control target
= control target key end

     0   :  { %s66_s0 = inlined_call_operand.vmem [shape: f32[8,256], index: 0, kind: input, shape index: {}]   ;;  %s67_s1 = inlined_call_operand.vmem [shape: f32[8,256], index: 1, kind: input, shape index: {}]   ;;  %s68_s2 = inlined_call_operand.vmem [shape: f32[8,256], index: 2, kind: output, shape index: {}]  }
   0x1   :  { %v11_v0 = vld [vmem:[%s66_s0] sm:$0xff]  ;;  %v12_v2 = vld [vmem:[%s66_s0 + $0x8] sm:$0xff] }
   0x2   :  { %v13_v1 = vld [vmem:[%s67_s1] sm:$0xff]  ;;  %v15_v3 = vmul.f32 %v11_v0, %v11_v0  ;;  %v14_v5 = vld [vmem:[%s67_s1 + $0x8] sm:$0xff]  ;;  %v16_v6 = vmul.f32 %v12_v2, %v12_v2 }
   0x3   :  { %v17_v4 = vmul.f32 %v13_v1, %v13_v1  ;;  %v18_v7 = vmul.f32 %v14_v5, %v14_v5 }
   0x5   :  { %v19_v8 = vadd.f32 %v17_v4, %v15_v3  ;;  %v20_v9 = vadd.f32 %v18_v7, %v16_v6 }
   0x7   :  { %29 = vtanh.f32 %v19_v8 }
   0x8   :  { %31 = vtanh.f32 %v20_v9 }
  0x14   :  { %v30_v10 = vpop.eup %29 }
  0x15   :  { %v32_v11 = vpop.eup %31  ;;  %23 = vst [vmem:[%s68_s2] sm:$0xff] %v30_v10 }
  0x16   :  { %24 = vst [vmem:[%s68_s2 + $0x8] sm:$0xff] %v32_v11 }

</bundles_post_ra>
